<compile_context>
chip_gen: v5e
topology: v5e:2x2
jax: 0.10.0
libtpu: 0.0.40
codegen_flags: <defaults>
</compile_context>

<pallas_src>
import functools
import math

import jax
import jax.numpy as jnp
from jax.experimental import pallas as pl
from jax.experimental.pallas import tpu as pltpu

_LN_10000 = math.log(10000.0)

# For small batch counts (and for packed non-power-of-two D) the sinusoidal table
# is precomputed once in XLA and streamed in as a row-tile-resident input block;
# for larger batches it is recomputed in-kernel at b == 0 and cached in VMEM.
_PE_INPUT_MAX_B = 4


def _pe_add_kernel(pe_ref, x_ref, o_ref):
    """out = x + pe.  pe block index is (i, 0): re-fetched only when the row tile
    changes, so every b > 0 step is a pure unmasked streaming add."""
    o_ref[...] = x_ref[...] + pe_ref[...]


def _pe_recompute_kernel(x_ref, o_ref, pe_ref, *, D, P, tile_R):
    """out = x + pe, with pe computed once per row tile (b == 0) into VMEM scratch.

    Each batch's (T, D) slab is viewed as (R, L) packed rows with L = P * D:
        t = row * P + lane // D,  d = lane % D
        pe[t, d] = sin(t * w) if d even else cos(t * w),  w = exp(-2*(d//2)*ln(1e4)/D)
    Used only when the lane -> (t, d) math is shift/and cheap (P == 1 or D pow2).
    """
    # program_id must be read at the top level of the kernel (NOT inside pl.when):
    # required for interpret-mode lowering; the scalars are then just cond operands.
    i = pl.program_id(0)
    b = pl.program_id(1)
    L = P * D

    @pl.when(b == 0)
    def _():
        lane = jax.lax.broadcasted_iota(jnp.int32, (1, L), 1)
        row0 = (i * (tile_R * P)).astype(jnp.float32)      # time index of the tile's row 0
        rows = jax.lax.broadcasted_iota(jnp.float32, (tile_R, L), 0)
        if P == 1:
            d = lane
            t = rows + row0
        else:
            d = lane & (D - 1)                             # D is a power of two here
            t = (rows * float(P) + row0
                 + (lane >> int(math.log2(D))).astype(jnp.float32))
        # ((d >> 1) * 2) == arange(0, D, 2)[d // 2]  -> matches the reference formula.
        inv_freq = jnp.exp(((d >> 1) * 2).astype(jnp.float32) * (-_LN_10000 / D))
        angle = t * inv_freq
        pe = jnp.where((d & 1) == 0, jnp.sin(angle), jnp.cos(angle))
        pe_ref[...] = pe.astype(pe_ref.dtype)

    o_ref[...] = x_ref[...] + pe_ref[...]


def _build_pe_table(T, D, R, L, dtype):
    """(R, L)-packed sinusoidal table, matching the PyTorch reference formula."""
    t = jnp.arange(T, dtype=jnp.float32)[:, None]
    div_term = jnp.exp(jnp.arange(0, D, 2, dtype=jnp.float32) * (-_LN_10000 / D))
    angle = t * div_term
    pe = jnp.zeros((T, D), jnp.float32)
    pe = pe.at[:, 0::2].set(jnp.sin(angle))
    pe = pe.at[:, 1::2].set(jnp.cos(angle[:, : D // 2]))
    return pe.reshape(R, L).astype(dtype)


def _vmem_budget_bytes():
    """(block byte budget, max rows per tile), sized per TPU generation."""
    try:
        kind = jax.devices()[0].device_kind.lower()
    except Exception:  # no devices / interpret
        kind = ""
    if "v5 lite" in kind or "v5e" in kind or "v5litepod" in kind:
        return 8 * 1024 * 1024, 2048           # v5e: 16 MiB scoped-VMEM default
    # v6e (32 MiB scoped / 128 MiB phys), v7x (32 MiB scoped / 64 MiB phys),
    # and CPU-interpret fallback: ~20 MiB of blocks stays safely under the limit.
    return 20 * 1024 * 1024, 8192


def _pick_row_tile(R, bytes_per_row, budget_bytes, max_rows):
    """Largest sublane-aligned row tile whose VMEM blocks fit the budget, with at
    least two row tiles whenever there is enough work (v7x megacore sharding).
    Non-dividing tiles are handled by a cdiv grid (masked last block)."""
    cap = max(8, min(max_rows, budget_bytes // max(bytes_per_row, 1)))
    cap -= cap % 8
    tile = R if R <= cap else cap
    if R >= 16 and tile > (R + 1) // 2:
        tile = max(8, (((R + 1) // 2) // 8) * 8)
    return tile


def positional_encoding(x, max_len=1000000):
    """JAX/Pallas equivalent of MapNet.positional_encoding.

    Args:
        x: (B, T, D) array (float32 or bfloat16).
    Returns:
        x + pos_encoding[:T], shape (B, T, D), same dtype as x.
    """
    B, T, D = x.shape
    if T > max_len:
        raise ValueError("sequence length exceeds max_len")

    # Lane-dense packing: view each batch's (T, D) slab as (R, L) rows.
    if D % 128 == 0:
        L = D                            # already lane-dense
    elif (T * D) % 128 == 0:
        L = 128                          # pack several time steps per 128-lane row
    else:
        L = D                            # lane-sparse fallback (still correct)
    R = (T * D) // L
    P = L // D if L % D == 0 else 0      # time steps per packed row (0: no clean packing)

    # In-kernel PE recompute only pays off for larger B, and only when the
    # lane -> (t, d) math is shift/and cheap; otherwise stream a precomputed table.
    cheap_index_math = (P == 1) or (P > 1 and (D & (D - 1)) == 0)
    use_pe_input = (B <= _PE_INPUT_MAX_B) or not cheap_index_math

    itemsize = jnp.dtype(x.dtype).itemsize
    # Double-buffered in + out blocks, plus either a double-buffered PE input
    # block or the persistent PE scratch (all stored in x.dtype).
    bytes_per_row = L * itemsize * (4 + (2 if use_pe_input else 1))
    budget, max_rows = _vmem_budget_bytes()
    tile_R = _pick_row_tile(R, bytes_per_row, budget, max_rows)
    num_tiles = pl.cdiv(R, tile_R)

    x_packed = x.reshape(B, R, L)
    # Squeezed (None) batch dim -> kernel sees 2D (tile_R, L) refs, no broadcast.
    io_spec = pl.BlockSpec((None, tile_R, L), lambda i, b: (b, i, 0))

    compiler_params = pltpu.CompilerParams(
        # Row tiles may shard across v7x's two TensorCores; B must stay innermost
        # and sequential ("arbitrary") so the PE block / scratch produced at b == 0
        # is reused by the remaining batches of the same row tile.
        dimension_semantics=("parallel", "arbitrary"),
        vmem_limit_bytes=32 * 1024 * 1024,
    )

    if use_pe_input:
        pe = _build_pe_table(T, D, R, L, x.dtype)
        out = pl.pallas_call(
            _pe_add_kernel,
            out_shape=jax.ShapeDtypeStruct((B, R, L), x.dtype),
            grid_spec=pltpu.PrefetchScalarGridSpec(
                num_scalar_prefetch=0,
                grid=(num_tiles, B),                 # B innermost -> PE block reuse
                in_specs=[pl.BlockSpec((tile_R, L), lambda i, b: (i, 0)),
                          io_spec],
                out_specs=io_spec,
            ),
            compiler_params=compiler_params,
        )(pe, x_packed)
    else:
        kernel = functools.partial(_pe_recompute_kernel, D=D, P=P, tile_R=tile_R)
        out = pl.pallas_call(
            kernel,
            out_shape=jax.ShapeDtypeStruct((B, R, L), x.dtype),
            grid_spec=pltpu.PrefetchScalarGridSpec(
                num_scalar_prefetch=0,
                grid=(num_tiles, B),                 # B innermost -> PE scratch reuse
                in_specs=[io_spec],
                out_specs=io_spec,
                scratch_shapes=[pltpu.VMEM((tile_R, L), x.dtype)],
            ),
            compiler_params=compiler_params,
        )(x_packed)

    return out.reshape(B, T, D)


def _positional_encoding_ref(x):
    """Pure-JAX reference (mirrors the PyTorch code) for correctness checking."""
    _, T, D = x.shape
    t = jnp.arange(T, dtype=jnp.float32)[:, None]
    div_term = jnp.exp(jnp.arange(0, D, 2, dtype=jnp.float32) * (-_LN_10000 / D))
    angle = t * div_term
    pe = jnp.zeros((T, D), jnp.float32)
    pe = pe.at[:, 0::2].set(jnp.sin(angle))
    pe = pe.at[:, 1::2].set(jnp.cos(angle[:, : D // 2]))
    return (x.astype(jnp.float32) + pe[None, :, :]).astype(x.dtype)


def mapnet_forward(x, end_inds):
    """MapNet.forward:  x, _ = vqvae.encode(x);  x = decoder(x, x, end_inds).

    Both submodules are constructor-injected and undefined in the provided source;
    positional_encoding (above) is MapNet's only self-contained compute.
    """
    # TODO(synk): vqvae.encode / decoder architectures are not part of MapNet's source.
    raise NotImplementedError(
        "vqvae / decoder are injected modules with no provided definition")


if __name__ == "__main__":
    key = jax.random.PRNGKey(0)

    # (B, T, D, dtype, atol):
    #   (2,   8,  32) small module-consistent shape, 4 steps packed / 128-lane row (PE-input path)
    #   (2,  16,  80) non-power-of-two D, still packed lane-dense (PE-input path)
    #   (2,  12,  40) lane-sparse fallback (T*D not a multiple of 128)
    #   (8, 256,  32) larger-B in-kernel PE recompute + cached scratch, 2 row tiles
    #   (8,  64, 128) larger-B recompute with D % 128 == 0 (P == 1)
    #   (2,  64, 128) bf16 fast path (PE table and add in bf16)
    cases = [
        (2, 8, 32, jnp.float32, 1e-5),
        (2, 16, 80, jnp.float32, 1e-5),
        (2, 12, 40, jnp.float32, 1e-5),
        (8, 256, 32, jnp.float32, 5e-4),
        (8, 64, 128, jnp.float32, 5e-4),
        (2, 64, 128, jnp.bfloat16, 1e-1),
    ]

    for idx, (B, T, D, dtype, atol) in enumerate(cases):
        x = jax.random.normal(jax.random.fold_in(key, idx), (B, T, D),
                              dtype=jnp.float32).astype(dtype)
        out = jax.block_until_ready(positional_encoding(x))
        ref = _positional_encoding_ref(x)
        assert out.shape == (B, T, D) and out.dtype == x.dtype
        err = float(jnp.max(jnp.abs(out.astype(jnp.float32) - ref.astype(jnp.float32))))
        assert err <= atol, f"mismatch for {(B, T, D, dtype)}: max abs err {err}"

    print("KERNEL_OK")
</pallas_src>

<mosaic_0001>
module attributes {stable_mosaic.version = 11 : i64} {
  func.func @_pe_add_kernel(%arg0: i32, %arg1: i32, %arg2: memref<2x128xf32, #tpu.memory_space<vmem>>, %arg3: memref<1x2x128xf32, #tpu.memory_space<vmem>>, %arg4: memref<1x2x128xf32, #tpu.memory_space<vmem>>) attributes {dimension_semantics = [#tpu.dimension_semantics<parallel>, #tpu.dimension_semantics<arbitrary>], iteration_bounds = array<i64: 1, 2>, scalar_prefetch = 0 : i64, scratch_operands = 0 : i64, tpu.core_type = #tpu.core_type<tc>, window_params = [{transform_indices = @transform_0, window_bounds = array<i64: 2, 128>}, {transform_indices = @transform_1, window_bounds = array<i64: 1, 2, 128>}, {transform_indices = @transform_2, window_bounds = array<i64: 1, 2, 128>}]} {
    %c0 = arith.constant 0 : index
    %c0_0 = arith.constant 0 : index
    %c0_1 = arith.constant 0 : index
    %0 = vector.load %arg3[%c0, %c0_0, %c0_1] : memref<1x2x128xf32, #tpu.memory_space<vmem>>, vector<1x2x128xf32>
    %1 = vector.shape_cast %0 : vector<1x2x128xf32> to vector<2x128xf32>
    %c0_2 = arith.constant 0 : index
    %c0_3 = arith.constant 0 : index
    %2 = vector.load %arg2[%c0_2, %c0_3] : memref<2x128xf32, #tpu.memory_space<vmem>>, vector<2x128xf32>
    %3 = arith.addf %1, %2 : vector<2x128xf32>
    %c0_4 = arith.constant 0 : index
    %c0_5 = arith.constant 0 : index
    %c0_6 = arith.constant 0 : index
    %4 = vector.load %arg4[%c0_4, %c0_5, %c0_6] : memref<1x2x128xf32, #tpu.memory_space<vmem>>, vector<1x2x128xf32>
    %5 = vector.shape_cast %4 : vector<1x2x128xf32> to vector<2x128xf32>
    %6 = vector.shape_cast %3 : vector<2x128xf32> to vector<1x2x128xf32>
    tpu.vector_store %arg4[%c0_4, %c0_5, %c0_6], %6 {strides = array<i32>} : memref<1x2x128xf32, #tpu.memory_space<vmem>>, vector<1x2x128xf32>,
    return
  }
  func.func @transform_0(%arg0: i32, %arg1: i32) -> (i32, i32) {
    %c0_i32 = arith.constant 0 : i32
    %c0_i32_0 = arith.constant 0 : i32
    return %arg0, %c0_i32 : i32, i32
  }
  func.func @transform_1(%arg0: i32, %arg1: i32) -> (i32, i32, i32) {
    %c0_i32 = arith.constant 0 : i32
    %c0_i32_0 = arith.constant 0 : i32
    return %arg1, %arg0, %c0_i32 : i32, i32, i32
  }
  func.func @transform_2(%arg0: i32, %arg1: i32) -> (i32, i32, i32) {
    %c0_i32 = arith.constant 0 : i32
    %c0_i32_0 = arith.constant 0 : i32
    return %arg1, %arg0, %c0_i32 : i32, i32, i32
  }
}

</mosaic_0001>

<bundles_post_ra>
// kernel: tpu_custom_call.1
= control target key start
LH: loop header
LB: loop body
LE: loop exit
PB: predicated region body
PF: predicated region fallthrough
CT: control target
= control target key end

     0   :  { %7 = vsyncpa [#allocation3], 0  ;;  %s716_s0 = inlined_call_operand.hbm [shape: f32[2,128], index: 0, kind: input, shape index: {}]   ;;  %s717_s1 = inlined_call_operand.hbm [shape: f32[2,2,128], index: 1, kind: input, shape index: {}]   ;;  %s718_s2 = inlined_call_operand.hbm [shape: f32[2,2,128], index: 2, kind: output, shape index: {}]  }
   0x1   :  { %8 = vsyncpa [#allocation6], 0 }
   0x2   :  { %10 = vsyncpa [#allocation6 + $0x1], 0 }
   0x3   :  { %11 = vsyncpa [#allocation4], 0 }
   0x4   :  { %13 = vsyncpa [#allocation4 + $0x1], 0  ;;  %s567_s9 = smov 0   ;;  %s569_s10 = smov 0  }
   0x5   :  { %s571_s11 = smov 0   ;;  %s573_s12 = smov 0  }
   0x6   :  { %s575_s13 = smov 0   ;;  %s577_s14 = smov 0  }
   0x7 LB: > { %s315_s15 = sadd.s32 4294967295, %s549_s14   ;;  %s316_s16 = sadd.s32 4294967294, %s549_s14   ;;  %s549_s14 = sphi %s577_s14, %s19_s14   ;;  %s545_s13 = sphi %s575_s13, %s730_s13   ;;  %s541_s12 = sphi %s573_s12, %s729_s12   ;;  %s537_s11 = sphi %s571_s11, %s728_s11   ;;  %s533_s10 = sphi %s569_s10, %s727_s10   ;;  %s529_s9 = sphi %s567_s9, %s726_s9  }
   0x8   : > { %p79_p0 = scmp.ne.s32.totalorder %s533_s10, %s529_s9  ;;  %p601_p1 = scmp.eq.s32.totalorder %s315_s15, 0 }
   0x9   : > { %p605_p2 = scmp.eq.s32.totalorder %s315_s15, 1  ;;  %p111_p3 = scmp.eq.s32.totalorder %s316_s16, 1 }
   0xa   : > { %p611_p4 = por %p601_p1, %p79_p0  ;;  %p317_p5 = scmp.ge.s32.totalorder %s549_s14, 1 }
   0xb   : > { %p616_p6 = por %p111_p3, %p79_p0  ;;  %p118_p7 = scmp.lt.s32.totalorder %s549_s14, 3 }
   0xc   : > { %s132_s23 = sshll.u32 %s716_s0, 4  ;;  %p319_p9 = scmp.ge.s32.totalorder %s549_s14, 2  ;;  %s133_s23 = int_to_ptr.hbm [resolvable:$true] %s132_s23 }
   0xd   : > { %p624_p8 = pnand %p317_p5, %p118_p7  ;;  %s551_s25 = smov [#allocation2]  }
   0xe   : > { %s134_s26 = sshll.u32 %s551_s25, 4  ;;  %s28_s27 = sadd.s32 1, %s545_s13  ;;  %s135_s26 = int_to_ptr.vmem [resolvable:$true] %s134_s26 }
   0xf   : > { %p338_p10 = pneg %p624_p8  ;;  %p29_p12 = scmp.ge.s32.totalorder %s28_s27, 2 }
  0x10   : > { %s66_s28 = sadd.s32 1, %s537_s11  ;;  %p73_p13 = scmp.ne.s32.totalorder %s537_s11, %s533_s10 }
  0x11   : > { %p339_p11 = pnand %p338_p10, %p601_p1  ;;  %p74_p0 = scmp.eq.s32.totalorder %s549_s14, 0 }
  0x12   : > { %s732_s27 = smov (%p29_p12, %s28_s27), 0  ;;  %p646_p5 = por %p605_p2, %p73_p13 }
  0x13   : > { %341 = dma.hbm_to_vmem [thread:$0]  (!%p339_p11), %s133_s23, 32, %s135_s26, [#allocation3]  }
  0x14   : > { %p640_p3 = por %p74_p0, %p73_p13  ;;  %s61_s3 = ssub.s32 %s545_s13, %s732_s27 }
  0x15   : > { %p351_p7 = scmp.lt.s32.totalorder %s549_s14, 2  ;;  %p64_p10 = scmp.eq.s32.totalorder %s61_s3, 0 }
  0x16   : > { %s145_s4 = sand.u32 1, %s537_s11   ;;  %s321_s7 = sshll.u32 %s545_s13, 1 }
  0x17   : > { %s320_s5 = sshll.u32 %s145_s4, 1  ;;  %s154_s16 = scalar_lea.hbm %s717_s1, %s321_s7 }
  0x18   : > { %s655_s6 = scalar_select %p64_p10, %s537_s11, %s66_s28  }
  0x19   : > { %s149_s21 = scalar_lea.vmem [#allocation5], %s320_s5  ;;  %s156_s18 = sshll.u32 %s154_s16, 4  ;;  %s157_s18 = int_to_ptr.hbm [resolvable:$true] %s156_s18 }
  0x1a   : > { %s158_s22 = sshll.u32 %s149_s21, 4  ;;  %p343_p2 = pnand %p351_p7, %p640_p3  ;;  %s159_s22 = int_to_ptr.vmem [resolvable:$true] %s158_s22 }
  0x1b   : > { %s146_s23 = scalar_lea.sflag [#allocation6], %s145_s4  ;;  %167 = sbr.rel (%p624_p8) target bundleno = 52 (0x34), region = 28 }
  0x1c   : > { %345 = dma.hbm_to_vmem [thread:$0]  (!%p343_p2), %s157_s18, 32, %s159_s22, %s146_s23  }
  0x20   : > { %516 = dma.done.wait (%p601_p1), [#allocation3], 32  }
  0x21   : > { %518 = vsyncadd (%p601_p1), [#allocation3], 4294967264  ;;  %s670_s25 = sand.u32 1, %s533_s10  }
  0x22   : > { %s324_s26 = sshll.u32 %s670_s25, 1  ;;  %s175_s28 = scalar_lea.sflag [#allocation6], %s670_s25 }
  0x23   : > { %s178_s29 = scalar_lea.vmem [#allocation5], %s324_s26 }
  0x24   : > { %520 = dma.done.wait (%p611_p4), %s175_s28, 32  }
  0x25   : > { %522 = vsyncadd (%p611_p4), %s175_s28, 4294967264  ;;  %s327_s24 = sshll.u32 %s541_s12, 1  ;;  %s199_s5 = scalar_lea.vmem [#allocation7], %s324_s26  ;;  %v200_v0 = vld [vmem:[%s178_s29] sm:$0x3] }
  0x26   : > { %s216_s4 = scalar_lea.hbm %s718_s2, %s327_s24  ;;  %s218_s7 = sshll.u32 %s199_s5, 4  ;;  %v201_v1 = vld [vmem:[#allocation2] sm:$0x3]  ;;  %s219_s7 = int_to_ptr.vmem [resolvable:$true] %s218_s7 }
  0x27   : > { %s220_s8 = sshll.u32 %s216_s4, 4  ;;  %v202_v2 = vadd.f32 %v201_v1, %v200_v0  ;;  %s205_s15 = scalar_lea.sflag [#allocation4], %s670_s25  ;;  %s221_s8 = int_to_ptr.hbm [resolvable:$true] %s220_s8 }
  0x28   : > { %s477_s19 = sshra.s32 %s221_s8, 4  ;;  %s483_s22 = scalar_lea.hbm %s718_s2, 4  ;;  %s478_s19 = int_to_ptr.hbm [resolvable:$true] %s477_s19 }
  0x29   : > { %203 = vst [vmem:[%s199_s5] sm:$0x3] %v202_v2  ;;  %s479_s16 = scalar_lea.hbm %s478_s19, 2  ;;  %p484_p11 = scmp.lt.s32.totalorder %s478_s19, %s718_s2 }
  0x2a   : > { %p480_p1 = scmp.ne.s32.totalorder %s478_s19, %s479_s16  ;;  %p485_p12 = scmp.lt.s32.totalorder %s483_s22, %s479_s16 }
  0x2c   : > { %p481_p4 = pnand %p480_p1, %p646_p5  ;;  %p486_p13 = por %p485_p12, %p484_p11 }
  0x2e   : > { %p482_p8 = pneg %p481_p4 }
  0x30   : > { %p487_p0 = pnand %p486_p13, %p482_p8 }
  0x32   : > { %490 = shalt.err (!%p487_p0)
}
  0x33   : > { %336 = dma.vmem_to_hbm [thread:$0]  (%p646_p5), %s219_s7, 32, %s221_s8, %s205_s15  }
  0x34 PF: > { %s232_s25 = sand.u32 1, %s529_s9   ;;  %p347_p3 = pnand %p319_p9, %p616_p6 }
  0x35   : > { %s233_s26 = scalar_lea.sflag [#allocation4], %s232_s25 }
  0x36   : > { %p348_p7 = pneg %p347_p3 }
  0x38   : > { %524 = dma.done.wait (%p348_p7), %s233_s26, 32  }
  0x39   : > { %526 = vsyncadd (%p348_p7), %s233_s26, 4294967264  ;;  %s19_s14 = sadd.s32 1, %s549_s14   ;;  %s726_s9 = smov %s533_s10 }
  0x3a   : > { %p16_p10 = scmp.ge.s32.totalorder %s19_s14, 4   ;;  %s727_s10 = smov %s537_s11 }
  0x3b   : > { %s728_s11 = smov %s655_s6  ;;  %s729_s12 = smov %s545_s13 }
  0x3c   : > { %s730_s13 = smov %s732_s27  ;;  %18 = sbr.rel (!%p16_p10) target bundleno = 7 (0x7), region = 79 }
  0x41   :  { %239 = vsyncpa [#allocation3], 1 }
  0x42   :  { %241 = vsyncpa [#allocation3 + $0x1], 1 }
  0x43   :  { %242 = vsyncpa [#allocation6], 1 }
  0x44   :  { %244 = vsyncpa [#allocation6 + $0x1], 1 }
  0x45   :  { %245 = vsyncpa [#allocation4], 1 }
  0x46   :  { %247 = vsyncpa [#allocation4 + $0x1], 1 }

</bundles_post_ra>
